<compile_context>
chip_gen: v5e
topology: v5e:2x2
jax: 0.10.0
libtpu: 0.0.40
codegen_flags: <defaults>
</compile_context>

<pallas_src>
import functools

import jax
import jax.numpy as jnp
from jax.experimental import pallas as pl
from jax.experimental.pallas import tpu as pltpu


R_PAD = 128  # rank dimension padded to a full lane width


def _lora_linear_kernel(x_ref, wt_ref, a_ref, b_ref, bias_ref, o_ref,
                        acc_base, acc_xa, *, scaling, tk):
    """Grid = (M//tm, N//tn, K//tk); k (axis 2) is the reduction axis."""
    j = pl.program_id(1)
    k = pl.program_id(2)

    @pl.when(k == 0)
    def _():
        acc_base[...] = jnp.zeros_like(acc_base)

    @pl.when((j == 0) & (k == 0))
    def _():
        acc_xa[...] = jnp.zeros_like(acc_xa)

    x = x_ref[...]

    # Base linear: (tm, tk) @ (tk, tn) -> (tm, tn), accumulated over K in f32.
    acc_base[...] += jnp.dot(x, wt_ref[...], preferred_element_type=jnp.float32)

    # LoRA down-projection is independent of j: compute it only on the first
    # N-tile and reuse the persistent scratch for all later j tiles.
    @pl.when(j == 0)
    def _():
        row0 = pl.multiple_of(k * tk, tk)
        a_blk = a_ref[pl.ds(row0, tk), :]            # (tk, R_PAD), resident in VMEM
        acc_xa[...] += jnp.dot(x, a_blk, preferred_element_type=jnp.float32)

    @pl.when(k == pl.num_programs(2) - 1)
    def _():
        # LoRA up-projection epilogue: (tm, R_PAD) @ (R_PAD, tn) -> (tm, tn).
        lora = jnp.dot(acc_xa[...], b_ref[...].astype(jnp.float32),
                       preferred_element_type=jnp.float32)
        o_ref[...] = (acc_base[...] + bias_ref[...].astype(jnp.float32)
                      + scaling * lora).astype(o_ref.dtype)


def _choose_tile(dim, cap, align):
    """Largest tile <= cap that divides dim (aligned), or dim itself if it fits."""
    if dim <= cap:
        return dim
    t = (cap // align) * align
    while t >= align:
        if dim % t == 0:
            return t
        t -= align
    raise ValueError(f"no aligned tile <= {cap} divides {dim}")


def prepare_lora_params(weight, bias, lora_A, lora_B,
                        compute_dtype=jnp.bfloat16, r_pad=R_PAD):
    """One-time parameter prep (done at load time, NOT per forward call):
    pre-transpose W, zero-pad the rank dim to r_pad lanes, cast to compute dtype."""
    N, K = weight.shape
    r = lora_A.shape[1]
    assert lora_B.shape == (r, N) and lora_A.shape == (K, r) and r <= r_pad
    wt = jnp.asarray(weight.T, dtype=compute_dtype)                     # (K, N)
    a_pad = jnp.zeros((K, r_pad), compute_dtype).at[:, :r].set(
        lora_A.astype(compute_dtype))                                   # (K, r_pad)
    b_pad = jnp.zeros((r_pad, N), compute_dtype).at[:r, :].set(
        lora_B.astype(compute_dtype))                                   # (r_pad, N)
    bias2d = jnp.asarray(bias, jnp.float32).reshape(1, N)               # (1, N)
    return wt, bias2d, a_pad, b_pad


def lora_linear_forward(x, wt, bias2d, a_pad, b_pad, scaling,
                        *, tm_cap=256, tn_cap=256, tk_cap=1024,
                        compute_dtype=jnp.bfloat16):
    """x: (B, S, K).  wt: (K, N) pre-transposed.  Returns (B, S, N) in x.dtype."""
    B, S, K = x.shape
    K_w, N = wt.shape
    assert K == K_w
    assert a_pad.shape == (K, R_PAD) and b_pad.shape == (R_PAD, N)

    M = B * S
    out_dtype = x.dtype
    x2d = x.reshape(M, K).astype(compute_dtype)

    tm = _choose_tile(M, tm_cap, 8)
    tn = _choose_tile(N, tn_cap, 128)
    tk = _choose_tile(K, tk_cap, 128)
    assert M % tm == 0 and N % tn == 0 and K % tk == 0

    # Explicit scoped-VMEM budget (v7x has only 64 MiB physical VMEM).
    c_it = jnp.dtype(compute_dtype).itemsize
    o_it = jnp.dtype(out_dtype).itemsize
    vmem_bytes = (
        2 * (tm * tk + tk * tn) * c_it      # double-buffered x, W^T tiles
        + 2 * K * R_PAD * c_it              # resident lora_A
        + 2 * (R_PAD * tn) * c_it           # lora_B tile
        + 2 * tn * 4                        # bias tile
        + 2 * tm * tn * o_it                # output double buffer
        + tm * tn * 4 + tm * R_PAD * 4      # f32 accumulators
    )
    vmem_limit = min(100 * 2**20, max(32 * 2**20, int(vmem_bytes * 3 // 2)))

    kernel = functools.partial(_lora_linear_kernel, scaling=float(scaling), tk=tk)

    out2d = pl.pallas_call(
        kernel,
        out_shape=jax.ShapeDtypeStruct((M, N), out_dtype),
        grid_spec=pltpu.PrefetchScalarGridSpec(
            num_scalar_prefetch=0,
            grid=(M // tm, N // tn, K // tk),
            in_specs=[
                pl.BlockSpec((tm, tk), lambda i, j, k: (i, k)),      # x tile
                pl.BlockSpec((tk, tn), lambda i, j, k: (k, j)),      # W^T tile
                pl.BlockSpec((K, R_PAD), lambda i, j, k: (0, 0)),    # lora_A (resident)
                pl.BlockSpec((R_PAD, tn), lambda i, j, k: (0, j)),   # lora_B tile
                pl.BlockSpec((1, tn), lambda i, j, k: (0, j)),       # bias tile
            ],
            out_specs=pl.BlockSpec((tm, tn), lambda i, j, k: (i, j)),
            scratch_shapes=[
                pltpu.VMEM((tm, tn), jnp.float32),      # base accumulator
                pltpu.VMEM((tm, R_PAD), jnp.float32),   # x @ lora_A accumulator
            ],
        ),
        compiler_params=pltpu.CompilerParams(
            # j carries the hoisted x@A dependence -> must stay sequential.
            dimension_semantics=("parallel", "arbitrary", "arbitrary"),
            vmem_limit_bytes=vmem_limit),
    )(x2d, wt, a_pad, b_pad, bias2d)

    return out2d.reshape(B, S, N)


def _reference(x, weight, bias, lora_A, lora_B, scaling, compute_dtype):
    """Pure-JAX reference using the same bf16-cast operands, f32 accumulation."""
    f32 = jnp.float32
    xb = x.astype(compute_dtype).astype(f32)
    wtb = weight.T.astype(compute_dtype).astype(f32)
    ab = lora_A.astype(compute_dtype).astype(f32)
    bb = lora_B.astype(compute_dtype).astype(f32)
    B, S, K = x.shape
    N = weight.shape[0]
    x2 = xb.reshape(-1, K)
    y = x2 @ wtb + bias.astype(f32) + scaling * ((x2 @ ab) @ bb)
    return y.reshape(B, S, N).astype(x.dtype)


if __name__ == "__main__":
    # Small shapes consistent with the module: nn.Linear(in=256, out=128), rank=8.
    batch, seq = 2, 8
    in_features, out_features = 256, 128
    rank, alpha = 8, 16.0
    scaling = alpha / rank
    dtype = jnp.float32

    key = jax.random.PRNGKey(0)
    kx, kw, kb, ka, kb2 = jax.random.split(key, 5)

    x = jax.random.normal(kx, (batch, seq, in_features), dtype=dtype)

    # Deterministic parameter init (mirrors nn.Linear + LoRALinear.initialize_parameters):
    w_bound = 1.0 / (in_features ** 0.5)
    weight = jax.random.uniform(kw, (out_features, in_features), dtype,
                                minval=-w_bound, maxval=w_bound)
    bias = jax.random.uniform(kb, (out_features,), dtype,
                              minval=-w_bound, maxval=w_bound)
    a_bound = 1.0 / (rank ** 0.5)  # kaiming_uniform_(a=sqrt(5)) on (in, rank)
    lora_A = jax.random.uniform(ka, (in_features, rank), dtype,
                                minval=-a_bound, maxval=a_bound)
    lora_B_init = jnp.zeros((rank, out_features), dtype)     # per module __init__
    lora_B_rand = 0.1 * jax.random.normal(kb2, (rank, out_features), dtype)

    for name, lora_B in (("init_B_zero", lora_B_init), ("rand_B", lora_B_rand)):
        wt, bias2d, a_pad, b_pad = prepare_lora_params(weight, bias, lora_A, lora_B)
        out = lora_linear_forward(x, wt, bias2d, a_pad, b_pad, scaling)
        out = jax.block_until_ready(out)
        ref = _reference(x, weight, bias, lora_A, lora_B, scaling, jnp.bfloat16)
        assert out.shape == (batch, seq, out_features)
        assert jnp.allclose(out, ref, atol=2e-3, rtol=2e-3), f"mismatch in {name}"

    print("KERNEL_OK")
</pallas_src>

<mosaic_0001>
module attributes {stable_mosaic.version = 11 : i64} {
  func.func @_lora_linear_kernel(%arg0: i32, %arg1: i32, %arg2: i32, %arg3: memref<16x256xbf16, #tpu.memory_space<vmem>>, %arg4: memref<256x128xbf16, #tpu.memory_space<vmem>>, %arg5: memref<256x128xbf16, #tpu.memory_space<vmem>>, %arg6: memref<128x128xbf16, #tpu.memory_space<vmem>>, %arg7: memref<1x128xf32, #tpu.memory_space<vmem>>, %arg8: memref<16x128xf32, #tpu.memory_space<vmem>>, %arg9: memref<16x128xf32, #tpu.memory_space<vmem>>, %arg10: memref<16x128xf32, #tpu.memory_space<vmem>>) attributes {dimension_semantics = [#tpu.dimension_semantics<parallel>, #tpu.dimension_semantics<arbitrary>, #tpu.dimension_semantics<arbitrary>], iteration_bounds = array<i64: 1, 1, 1>, scalar_prefetch = 0 : i64, scratch_operands = 2 : i64, tpu.core_type = #tpu.core_type<tc>, window_params = [{transform_indices = @transform_0, window_bounds = array<i64: 16, 256>}, {transform_indices = @transform_1, window_bounds = array<i64: 256, 128>}, {pipeline_mode = #tpu.pipeline_mode<synchronous>, transform_indices = @transform_2, window_bounds = array<i64: 256, 128>}, {transform_indices = @transform_3, window_bounds = array<i64: 128, 128>}, {transform_indices = @transform_4, window_bounds = array<i64: 1, 128>}, {transform_indices = @transform_5, window_bounds = array<i64: 16, 128>}]} {
    %c0_i32 = arith.constant 0 : i32
    %0 = arith.cmpi eq, %arg2, %c0_i32 : i32
    %1 = arith.extui %0 : i1 to i32
    %c0_i32_0 = arith.constant 0 : i32
    %2 = arith.cmpi ne, %1, %c0_i32_0 : i32
    scf.if %2 {
      %cst_15 = arith.constant 0.000000e+00 : f32
      %20 = vector.broadcast %cst_15 : f32 to vector<16x128xf32>
      %c0_16 = arith.constant 0 : index
      %c0_17 = arith.constant 0 : index
      %21 = vector.load %arg9[%c0_16, %c0_17] : memref<16x128xf32, #tpu.memory_space<vmem>>, vector<16x128xf32>
      tpu.vector_store %arg9[%c0_16, %c0_17], %20 {strides = array<i32>} : memref<16x128xf32, #tpu.memory_space<vmem>>, vector<16x128xf32>,
    } else {
    }
    %c0_i32_1 = arith.constant 0 : i32
    %3 = arith.cmpi eq, %arg1, %c0_i32_1 : i32
    %c0_i32_2 = arith.constant 0 : i32
    %4 = arith.cmpi eq, %arg2, %c0_i32_2 : i32
    %5 = arith.andi %3, %4 : i1
    %6 = arith.extui %5 : i1 to i32
    %c0_i32_3 = arith.constant 0 : i32
    %7 = arith.cmpi ne, %6, %c0_i32_3 : i32
    scf.if %7 {
      %cst_15 = arith.constant 0.000000e+00 : f32
      %20 = vector.broadcast %cst_15 : f32 to vector<16x128xf32>
      %c0_16 = arith.constant 0 : index
      %c0_17 = arith.constant 0 : index
      %21 = vector.load %arg10[%c0_16, %c0_17] : memref<16x128xf32, #tpu.memory_space<vmem>>, vector<16x128xf32>
      tpu.vector_store %arg10[%c0_16, %c0_17], %20 {strides = array<i32>} : memref<16x128xf32, #tpu.memory_space<vmem>>, vector<16x128xf32>,
    } else {
    }
    %c0 = arith.constant 0 : index
    %c0_4 = arith.constant 0 : index
    %8 = vector.load %arg3[%c0, %c0_4] : memref<16x256xbf16, #tpu.memory_space<vmem>>, vector<16x256xbf16>
    %c0_5 = arith.constant 0 : index
    %c0_6 = arith.constant 0 : index
    %9 = vector.load %arg9[%c0_5, %c0_6] : memref<16x128xf32, #tpu.memory_space<vmem>>, vector<16x128xf32>
    %c0_7 = arith.constant 0 : index
    %c0_8 = arith.constant 0 : index
    %10 = vector.load %arg4[%c0_7, %c0_8] : memref<256x128xbf16, #tpu.memory_space<vmem>>, vector<256x128xbf16>
    %cst = arith.constant dense<0.000000e+00> : vector<16x128xf32>
    %11 = tpu.matmul %8, %10, %cst {dimension_numbers = #tpu.dot_dimension_numbers<[1], [0], [0], [1], [0, 0, 1, 1], [], []>} : vector<16x256xbf16>, vector<256x128xbf16>, vector<16x128xf32> -> vector<16x128xf32>
    %12 = arith.addf %9, %11 : vector<16x128xf32>
    %c0_9 = arith.constant 0 : index
    %c0_10 = arith.constant 0 : index
    %13 = vector.load %arg9[%c0_9, %c0_10] : memref<16x128xf32, #tpu.memory_space<vmem>>, vector<16x128xf32>
    tpu.vector_store %arg9[%c0_9, %c0_10], %12 {strides = array<i32>} : memref<16x128xf32, #tpu.memory_space<vmem>>, vector<16x128xf32>,
    %c0_i32_11 = arith.constant 0 : i32
    %14 = arith.cmpi eq, %arg1, %c0_i32_11 : i32
    %15 = arith.extui %14 : i1 to i32
    %c0_i32_12 = arith.constant 0 : i32
    %16 = arith.cmpi ne, %15, %c0_i32_12 : i32
    scf.if %16 {
      %c256_i32 = arith.constant 256 : i32
      %20 = arith.muli %arg2, %c256_i32 : i32
      %21 = tpu.assume_multiple %20, 256 : i32
      %22 = arith.index_cast %21 : i32 to index
      %c0_15 = arith.constant 0 : index
      %23 = vector.load %arg5[%22, %c0_15] : memref<256x128xbf16, #tpu.memory_space<vmem>>, vector<256x128xbf16>
      %c0_16 = arith.constant 0 : index
      %c0_17 = arith.constant 0 : index
      %24 = vector.load %arg10[%c0_16, %c0_17] : memref<16x128xf32, #tpu.memory_space<vmem>>, vector<16x128xf32>
      %cst_18 = arith.constant dense<0.000000e+00> : vector<16x128xf32>
      %25 = tpu.matmul %8, %23, %cst_18 {dimension_numbers = #tpu.dot_dimension_numbers<[1], [0], [0], [1], [0, 0, 1, 1], [], []>} : vector<16x256xbf16>, vector<256x128xbf16>, vector<16x128xf32> -> vector<16x128xf32>
      %26 = arith.addf %24, %25 : vector<16x128xf32>
      %c0_19 = arith.constant 0 : index
      %c0_20 = arith.constant 0 : index
      %27 = vector.load %arg10[%c0_19, %c0_20] : memref<16x128xf32, #tpu.memory_space<vmem>>, vector<16x128xf32>
      tpu.vector_store %arg10[%c0_19, %c0_20], %26 {strides = array<i32>} : memref<16x128xf32, #tpu.memory_space<vmem>>, vector<16x128xf32>,
    } else {
    }
    %c0_i32_13 = arith.constant 0 : i32
    %17 = arith.cmpi eq, %arg2, %c0_i32_13 : i32
    %18 = arith.extui %17 : i1 to i32
    %c0_i32_14 = arith.constant 0 : i32
    %19 = arith.cmpi ne, %18, %c0_i32_14 : i32
    scf.if %19 {
      %c0_15 = arith.constant 0 : index
      %c0_16 = arith.constant 0 : index
      %20 = vector.load %arg10[%c0_15, %c0_16] : memref<16x128xf32, #tpu.memory_space<vmem>>, vector<16x128xf32>
      %c0_17 = arith.constant 0 : index
      %c0_18 = arith.constant 0 : index
      %21 = vector.load %arg6[%c0_17, %c0_18] : memref<128x128xbf16, #tpu.memory_space<vmem>>, vector<128x128xbf16>
      %22 = arith.extf %21 : vector<128x128xbf16> to vector<128x128xf32>
      %cst_19 = arith.constant dense<0.000000e+00> : vector<16x128xf32>
      %23 = tpu.matmul %20, %22, %cst_19 {dimension_numbers = #tpu.dot_dimension_numbers<[1], [0], [0], [1], [0, 0, 1, 1], [], []>} : vector<16x128xf32>, vector<128x128xf32>, vector<16x128xf32> -> vector<16x128xf32>
      %c0_20 = arith.constant 0 : index
      %c0_21 = arith.constant 0 : index
      %24 = vector.load %arg9[%c0_20, %c0_21] : memref<16x128xf32, #tpu.memory_space<vmem>>, vector<16x128xf32>
      %c0_22 = arith.constant 0 : index
      %c0_23 = arith.constant 0 : index
      %25 = vector.load %arg7[%c0_22, %c0_23] : memref<1x128xf32, #tpu.memory_space<vmem>>, vector<1x128xf32>
      %26 = vector.broadcast %25 : vector<1x128xf32> to vector<16x128xf32>
      %27 = arith.addf %24, %26 : vector<16x128xf32>
      %cst_24 = arith.constant 2.000000e+00 : f32
      %28 = vector.broadcast %cst_24 : f32 to vector<16x128xf32>
      %29 = arith.mulf %28, %23 : vector<16x128xf32>
      %30 = arith.addf %27, %29 : vector<16x128xf32>
      %c0_25 = arith.constant 0 : index
      %c0_26 = arith.constant 0 : index
      %31 = vector.load %arg8[%c0_25, %c0_26] : memref<16x128xf32, #tpu.memory_space<vmem>>, vector<16x128xf32>
      tpu.vector_store %arg8[%c0_25, %c0_26], %30 {strides = array<i32>} : memref<16x128xf32, #tpu.memory_space<vmem>>, vector<16x128xf32>,
    } else {
    }
    return
  }
  func.func @transform_0(%arg0: i32, %arg1: i32, %arg2: i32) -> (i32, i32) {
    %c0_i32 = arith.constant 0 : i32
    return %arg0, %arg2 : i32, i32
  }
  func.func @transform_1(%arg0: i32, %arg1: i32, %arg2: i32) -> (i32, i32) {
    %c0_i32 = arith.constant 0 : i32
    return %arg2, %arg1 : i32, i32
  }
  func.func @transform_2(%arg0: i32, %arg1: i32, %arg2: i32) -> (i32, i32) {
    %c0_i32 = arith.constant 0 : i32
    %c0_i32_0 = arith.constant 0 : i32
    %c0_i32_1 = arith.constant 0 : i32
    return %c0_i32, %c0_i32_0 : i32, i32
  }
  func.func @transform_3(%arg0: i32, %arg1: i32, %arg2: i32) -> (i32, i32) {
    %c0_i32 = arith.constant 0 : i32
    %c0_i32_0 = arith.constant 0 : i32
    return %c0_i32, %arg1 : i32, i32
  }
  func.func @transform_4(%arg0: i32, %arg1: i32, %arg2: i32) -> (i32, i32) {
    %c0_i32 = arith.constant 0 : i32
    %c0_i32_0 = arith.constant 0 : i32
    return %c0_i32, %arg1 : i32, i32
  }
  func.func @transform_5(%arg0: i32, %arg1: i32, %arg2: i32) -> (i32, i32) {
    %c0_i32 = arith.constant 0 : i32
    return %arg0, %arg1 : i32, i32
  }
}

</mosaic_0001>

<bundles_post_ra>
// kernel: tpu_custom_call.1
= control target key start
LH: loop header
LB: loop body
LE: loop exit
PB: predicated region body
PF: predicated region fallthrough
CT: control target
= control target key end

     0   :  { %10 = vsyncpa [#allocation5], 0  ;;  %s964_s0 = inlined_call_operand.hbm [shape: bf16[16,256], index: 0, kind: input, shape index: {}]   ;;  %s965_s1 = inlined_call_operand.hbm [shape: bf16[256,128], index: 1, kind: input, shape index: {}]   ;;  %s966_s2 = inlined_call_operand.hbm [shape: bf16[256,128], index: 2, kind: input, shape index: {}]   ;;  %s967_s3 = inlined_call_operand.hbm [shape: bf16[128,128], index: 3, kind: input, shape index: {}]   ;;  %s968_s4 = inlined_call_operand.vmem [shape: f32[1,128], index: 4, kind: input, shape index: {}]   ;;  %s969_s5 = inlined_call_operand.hbm [shape: f32[16,128], index: 5, kind: output, shape index: {}]  }
   0x1   :  { %11 = vsyncpa [#allocation8], 0 }
   0x2   :  { %12 = vsyncpa [#allocation11], 0  ;;  %s31_s20 = sshll.u32 %s965_s1, 4  ;;  %s32_s20 = int_to_ptr.hbm [resolvable:$true] %s31_s20 }
   0x3   :  { %13 = vsyncpa [#allocation6], 0  ;;  %s901_s21 = smov [#allocation7]   ;;  %s18_s25 = sshll.u32 %s964_s0, 4  ;;  %s19_s25 = int_to_ptr.hbm [resolvable:$true] %s18_s25 }
   0x4   :  { %s33_s22 = sshll.u32 %s901_s21, 4  ;;  %s902_s26 = smov 64   ;;  %s34_s22 = int_to_ptr.vmem [resolvable:$true] %s33_s22 }
   0x5   :  { %s903_s27 = smov 4   ;;  %s904_s28 = smov [#allocation4]  }
   0x6   :  { %39 = dma.hbm_to_vmem [thread:$0]  %s32_s20, 2048, %s34_s22, [#allocation8], %s902_s26, %s902_s26, %s903_s27  }
   0x7   :  { %s20_s29 = sshll.u32 %s904_s28, 4  ;;  %s905_s30 = smov 128   ;;  %s21_s29 = int_to_ptr.vmem [resolvable:$true] %s20_s29 }
   0x8   :  { %s906_s6 = smov 8   ;;  %s44_s8 = sshll.u32 %s966_s2, 4  ;;  %s45_s8 = int_to_ptr.hbm [resolvable:$true] %s44_s8 }
   0x9   :  { %26 = dma.hbm_to_vmem [thread:$0]  %s19_s25, 256, %s21_s29, [#allocation5], %s905_s30, %s905_s30, %s906_s6  }
   0xa   :  { %s907_s9 = smov [#allocation9]   ;;  %s57_s12 = sshll.u32 %s967_s3, 4  ;;  %s58_s12 = int_to_ptr.hbm [resolvable:$true] %s57_s12 }
   0xb   :  { %s46_s0 = sshll.u32 %s907_s9, 4  ;;  %s908_s13 = smov [#allocation10]   ;;  %s47_s0 = int_to_ptr.vmem [resolvable:$true] %s46_s0 }
   0xc   :  { %52 = dma.hbm_to_vmem [thread:$0]  %s45_s8, 2048, %s47_s0, [#allocation8], %s902_s26, %s902_s26, %s903_s27  }
   0xd   :  { %s59_s14 = sshll.u32 %s908_s13, 4  ;;  %s60_s14 = int_to_ptr.vmem [resolvable:$true] %s59_s14 }
   0xe   :  { %65 = dma.hbm_to_vmem [thread:$0]  %s58_s12, 1024, %s60_s14, [#allocation11], %s902_s26, %s902_s26, %s903_s27  }
   0xf   :  { %893 = dma.done.wait [#allocation5], 256  }
  0x10   :  { %894 = vsyncadd [#allocation5], 4294967040 }
  0x11   :  { %895 = dma.done.wait [#allocation8], 4096  }
  0x12   :  { %896 = vsyncadd [#allocation8], 4294963200 }
  0x13   :  { %897 = dma.done.wait [#allocation11], 1024  }
  0x14   :  { %898 = vsyncadd [#allocation11], 4294966272  ;;  %v699_v0 = vld [vmem:[#allocation9 + $0x38] sm:$0xff]  ;;  %v698_v2 = vld [vmem:[#allocation9 + $0x30] sm:$0xff]  ;;  %s909_s15 = smov [#allocation12]   ;;  %s521_s19 = sshll.u32 %s969_s5, 4  ;;  %s522_s19 = int_to_ptr.hbm [resolvable:$true] %s521_s19 }
  0x15   :  { %v707_v1 = vld [vmem:[#allocation9 + $0x78] sm:$0xff]  ;;  %409 = vmatpush.bf16.msra.mxu2 %v699_v0  ;;  %v706_v3 = vld [vmem:[#allocation9 + $0x70] sm:$0xff]  ;;  %v697_v4 = vld [vmem:[#allocation9 + $0x28] sm:$0xff]  ;;  %s519_s16 = sshll.u32 %s909_s15, 4  ;;  %s520_s16 = int_to_ptr.vmem [resolvable:$true] %s519_s16 }
  0x16   :  { %423 = vmatpush.bf16.msra.mxu3 %v707_v1  ;;  %v705_v5 = vld [vmem:[#allocation9 + $0x68] sm:$0xff]  ;;  %v683_v6 = vld [vmem:[#allocation7 + $0x38] sm:$0xff]  ;;  %v682_v8 = vld [vmem:[#allocation7 + $0x30] sm:$0xff] }
  0x17   :  { %v691_v7 = vld [vmem:[#allocation7 + $0x78] sm:$0xff]  ;;  %239 = vmatpush.bf16.msra.mxu0 %v683_v6  ;;  %v690_v9 = vld [vmem:[#allocation7 + $0x70] sm:$0xff]  ;;  %v696_v10 = vld [vmem:[#allocation9 + $0x20] sm:$0xff] }
  0x18   :  { %253 = vmatpush.bf16.msra.mxu1 %v691_v7  ;;  %v704_v11 = vld [vmem:[#allocation9 + $0x60] sm:$0xff]  ;;  %v681_v12 = vld [vmem:[#allocation7 + $0x28] sm:$0xff]  ;;  %v695_v14 = vld [vmem:[#allocation9 + $0x18] sm:$0xff] }
  0x19   :  { %410 = vmatpush.bf16.msra.mxu2 %v698_v2  ;;  %v689_v13 = vld [vmem:[#allocation7 + $0x68] sm:$0xff]  ;;  %v703_v15 = vld [vmem:[#allocation9 + $0x58] sm:$0xff]  ;;  %v680_v16 = vld [vmem:[#allocation7 + $0x20] sm:$0xff] }
  0x1a   :  { %424 = vmatpush.bf16.msra.mxu3 %v706_v3  ;;  %v688_v17 = vld [vmem:[#allocation7 + $0x60] sm:$0xff]  ;;  %v694_v18 = vld [vmem:[#allocation9 + $0x10] sm:$0xff]  ;;  %v679_v20 = vld [vmem:[#allocation7 + $0x18] sm:$0xff] }
  0x1b   :  { %240 = vmatpush.bf16.msra.mxu0 %v682_v8  ;;  %v702_v19 = vld [vmem:[#allocation9 + $0x50] sm:$0xff]  ;;  %v687_v21 = vld [vmem:[#allocation7 + $0x58] sm:$0xff]  ;;  %v693_v22 = vld [vmem:[#allocation9 + $0x8] sm:$0xff] }
  0x1c   :  { %254 = vmatpush.bf16.msra.mxu1 %v690_v9  ;;  %v701_v23 = vld [vmem:[#allocation9 + $0x48] sm:$0xff]  ;;  %v692_v24 = vld [vmem:[#allocation9] sm:$0xff]  ;;  %v678_v25 = vld [vmem:[#allocation7 + $0x10] sm:$0xff] }
  0x1d   :  { %411 = vmatpush.bf16.msra.mxu2 %v697_v4  ;;  %v700_v26 = vld [vmem:[#allocation9 + $0x40] sm:$0xff]  ;;  %v540_v27 = vld [vmem:[#allocation4] sm:$0xf]  ;;  %v675_v29 = vld [vmem:[#allocation4 + $0x4] sm:$0xf0] }
  0x1e   :  { %425 = vmatpush.bf16.msra.mxu3 %v705_v5  ;;  %v686_v28 = vld [vmem:[#allocation7 + $0x50] sm:$0xff]  ;;  %v542_v31 = vld [vmem:[#allocation4 + $0x8] sm:$0xf0]  ;;  %v677_v32 = vld [vmem:[#allocation7 + $0x8] sm:$0xff]  ;;  %v541_v33 = vor.u32 %v675_v29, %v540_v27 }
  0x1f   :  { %241 = vmatpush.bf16.msra.mxu0 %v681_v12  ;;  %v674_v30 = vld [vmem:[#allocation4 + $0x4] sm:$0xf]  ;;  %v746_v35 = vld [vmem:[#allocation10 + $0x38] sm:$0xff]   ;;  %v685_v36 = vld [vmem:[#allocation7 + $0x48] sm:$0xff] }
  0x20   :  { %255 = vmatpush.bf16.msra.mxu1 %v689_v13  ;;  %v545_v34 = vor.u32 %v674_v30, %v542_v31  ;;  %v676_v37 = vld [vmem:[#allocation7] sm:$0xff]  ;;  %v739_v38 = vunpack.c.h.bf16 %v746_v35  ;;  %v745_v39 = vld [vmem:[#allocation10 + $0x30] sm:$0xff]   ;;  %v738_v41 = vunpack.c.l.bf16 %v746_v35  ;;  %v744_v43 = vld [vmem:[#allocation10 + $0x28] sm:$0xff]  }
  0x21   :  { %412 = vmatpush.bf16.msra.mxu2 %v696_v10  ;;  %v684_v40 = vld [vmem:[#allocation7 + $0x40] sm:$0xff]  ;;  %v735_v42 = vunpack.c.h.bf16 %v745_v39  ;;  %v734_v44 = vunpack.c.l.bf16 %v745_v39  ;;  %v731_v45 = vunpack.c.h.bf16 %v744_v43  ;;  %v730_v47 = vunpack.c.l.bf16 %v744_v43  ;;  %v742_v49 = vld [vmem:[#allocation10 + $0x18] sm:$0xff]   ;;  %v741_v52 = vld [vmem:[#allocation10 + $0x10] sm:$0xff]  }
  0x22   :  { %426 = vmatpush.bf16.msra.mxu3 %v704_v11  ;;  %v743_v46 = vld [vmem:[#allocation10 + $0x20] sm:$0xff]   ;;  %v723_v51 = vunpack.c.h.bf16 %v742_v49  ;;  %v722_v53 = vunpack.c.l.bf16 %v742_v49  ;;  %v719_v54 = vunpack.c.h.bf16 %v741_v52  ;;  %v740_v55 = vld [vmem:[#allocation10 + $0x8] sm:$0xff]   ;;  %v718_v56 = vunpack.c.l.bf16 %v741_v52  ;;  %v772_v8 = vld [vmem:[%s968_s4] ss:$0 sm:$0xff] }
  0x23   :  { %242 = vmatpush.bf16.msra.mxu0 %v680_v16  ;;  %v727_v48 = vunpack.c.h.bf16 %v743_v46  ;;  %v726_v50 = vunpack.c.l.bf16 %v743_v46  ;;  %v715_v57 = vunpack.c.h.bf16 %v740_v55  ;;  %v714_v58 = vunpack.c.l.bf16 %v740_v55  ;;  %v709_v59 = vld [vmem:[#allocation10] sm:$0xff]  }
  0x24   :  { %256 = vmatpush.bf16.msra.mxu1 %v688_v17  ;;  %v711_v60 = vunpack.c.h.bf16 %v709_v59  ;;  %v710_v61 = vunpack.c.l.bf16 %v709_v59 }
  0x25   :  { %413 = vmatpush.bf16.msra.mxu2 %v695_v14 }
  0x26   :  { %427 = vmatpush.bf16.msra.mxu3 %v703_v15 }
  0x27   :  { %243 = vmatpush.bf16.msra.mxu0 %v679_v20 }
  0x28   :  { %257 = vmatpush.bf16.msra.mxu1 %v687_v21 }
  0x29   :  { %414 = vmatpush.bf16.msra.mxu2 %v694_v18 }
  0x2a   :  { %428 = vmatpush.bf16.msra.mxu3 %v702_v19 }
  0x2b   :  { %244 = vmatpush.bf16.msra.mxu0 %v678_v25 }
  0x2c   :  { %258 = vmatpush.bf16.msra.mxu1 %v686_v28 }
  0x2d   :  { %415 = vmatpush.bf16.msra.mxu2 %v693_v22 }
  0x2e   :  { %429 = vmatpush.bf16.msra.mxu3 %v701_v23 }
  0x2f   :  { %245 = vmatpush.bf16.msra.mxu0 %v677_v32 }
  0x30   :  { %259 = vmatpush.bf16.msra.mxu1 %v685_v36 }
  0x31   :  { %416 = vmatpush.bf16.msra.mxu2 %v692_v24 }
  0x32   :  { %430 = vmatpush.bf16.msra.mxu3 %v700_v26 }
  0x33   :  { %246 = vmatpush.bf16.msra.mxu0 %v676_v37 }
  0x34   :  { %417 = vmatmul.bf16.vlgmr.msra.gmra.mxu2 %v541_v33  ;;  %260 = vmatpush.bf16.msra.mxu1 %v684_v40 }
  0x35   :  { %431 = vmatmul.bf16.vlgmr.msra.gmra.mxu3 %v545_v34 }
  0x36   :  { %247 = vmatmul.bf16.vlgmr.msra.gmra.mxu0 %v541_v33 }
  0x37   :  { %478 = vmatpush.msrb.mxu0 %v739_v38  ;;  %261 = vmatmul.bf16.vlgmr.msra.gmra.mxu1 %v545_v34 }
  0x38   :  { %747 = vmatpush.msrb.mxu1 %v739_v38 }
  0x39   :  { %479 = vmatpush.msrb.mxu0 %v738_v41 }
  0x3a   :  { %748 = vmatpush.msrb.mxu1 %v738_v41 }
  0x3b   :  { %480 = vmatpush.msrb.mxu0 %v735_v42 }
  0x3c   :  { %749 = vmatpush.msrb.mxu1 %v735_v42 }
  0x3d   :  { %481 = vmatpush.msrb.mxu0 %v734_v44 }
  0x3e   :  { %750 = vmatpush.msrb.mxu1 %v734_v44 }
  0x3f   :  { %482 = vmatpush.msrb.mxu0 %v731_v45 }
  0x40   :  { %751 = vmatpush.msrb.mxu1 %v731_v45 }
  0x41   :  { %483 = vmatpush.msrb.mxu0 %v730_v47 }
  0x42   :  { %752 = vmatpush.msrb.mxu1 %v730_v47 }
  0x43   :  { %484 = vmatpush.msrb.mxu0 %v727_v48 }
  0x44   :  { %753 = vmatpush.msrb.mxu1 %v727_v48 }
  0x45   :  { %485 = vmatpush.msrb.mxu0 %v726_v50 }
  0x46   :  { %754 = vmatpush.msrb.mxu1 %v726_v50 }
  0x47   :  { %486 = vmatpush.msrb.mxu0 %v723_v51 }
  0x48   :  { %755 = vmatpush.msrb.mxu1 %v723_v51 }
  0x49   :  { %487 = vmatpush.msrb.mxu0 %v722_v53 }
  0x4a   :  { %756 = vmatpush.msrb.mxu1 %v722_v53 }
  0x4b   :  { %488 = vmatpush.msrb.mxu0 %v719_v54 }
  0x4c   :  { %757 = vmatpush.msrb.mxu1 %v719_v54 }
  0x4d   :  { %489 = vmatpush.msrb.mxu0 %v718_v56 }
  0x4e   :  { %758 = vmatpush.msrb.mxu1 %v718_v56 }
  0x4f   :  { %490 = vmatpush.msrb.mxu0 %v715_v57 }
  0x50   :  { %759 = vmatpush.msrb.mxu1 %v715_v57 }
  0x51   :  { %491 = vmatpush.msrb.mxu0 %v714_v58 }
  0x52   :  { %760 = vmatpush.msrb.mxu1 %v714_v58 }
  0x53   :  { %492 = vmatpush.msrb.mxu0 %v711_v60 }
  0x54   :  { %761 = vmatpush.msrb.mxu1 %v711_v60 }
  0x55   :  { %493 = vmatpush.msrb.mxu0 %v710_v61 }
  0x56   :  { %762 = vmatpush.msrb.mxu1 %v710_v61 }
  0xb3   :  { %v248_v4 = vpop.f32.mrf.mxu0 }
  0xb4   :  { %v262_v5 = vpop.f32.mrf.mxu1 }
  0xb5   :  { %v263_v7 = vadd.f32 %v262_v5, %v248_v4 }
  0xb7   :  { %v418_v62 = vpop.f32.mrf.mxu2  ;;  %v507_v11 = vadd.f32 %v772_v8, %v263_v7 }
  0xb8   :  { %v432_v63 = vpop.f32.mrf.mxu3 }
  0xb9   :  { %v433_v0 = vadd.f32 %v432_v63, %v418_v62 }
  0xbb   :  { %494 = vmatmul.f32.vlgmr.msrb.gmra.mxu0 %v433_v0  ;;  %v250_v6 = vpop.f32.mrf.mxu0 }
  0xbc   :  { %v264_v9 = vpop.f32.mrf.mxu1 }
  0xbd   :  { %v265_v14 = vadd.f32 %v264_v9, %v250_v6 }
  0xbf   :  { %v420_v1 = vpop.f32.mrf.mxu2  ;;  %v508_v16 = vadd.f32 %v772_v8, %v265_v14 }
  0xc0   :  { %v434_v2 = vpop.f32.mrf.mxu3 }
  0xc1   :  { %v435_v3 = vadd.f32 %v434_v2, %v420_v1 }
  0xc3   :  { %497 = vmatmul.f32.vlgmr.msrb.gmra.mxu1 %v435_v3 }
 0x138   :  { %v495_v10 = vpop.f32.mrf.mxu0 }
 0x139   :  { %v509_v12 = vmul.f32 2.0, %v495_v10 }
 0x13b   :  { %v511_v13 = vadd.f32 %v509_v12, %v507_v11 }
 0x13d   :  { %513 = vst [vmem:[#allocation12] sm:$0xff] %v511_v13 }
 0x140   :  { %v498_v15 = vpop.f32.mrf.mxu1 }
 0x141   :  { %v510_v17 = vmul.f32 2.0, %v498_v15 }
 0x143   :  { %v512_v18 = vadd.f32 %v510_v17, %v508_v16 }
 0x145   :  { %514 = vst [vmem:[#allocation12 + $0x8] sm:$0xff] %v512_v18 }
 0x146   :  { %527 = dma.vmem_to_hbm [thread:$0]  %s520_s16, 256, %s522_s19, [#allocation6], %s905_s30, %s905_s30, %s906_s6  }
 0x147   :  { %899 = dma.done.wait [#allocation6], 256  }
 0x148   :  { %900 = vsyncadd [#allocation6], 4294967040 }
 0x149   :  { %532 = vsyncpa [#allocation5], 1 }
 0x14a   :  { %533 = vsyncpa [#allocation8], 1 }
 0x14b   :  { %534 = vsyncpa [#allocation11], 1 }
 0x14c   :  { %535 = vsyncpa [#allocation6], 1 }

</bundles_post_ra>
